<compile_context>
chip_gen: v5e
topology: v5e:2x2
jax: 0.10.0
libtpu: 0.0.40
codegen_flags: <defaults>
</compile_context>

<pallas_src>
import jax
import jax.numpy as jnp
from jax.experimental import pallas as pl
from jax.experimental.pallas import tpu as pltpu


# ---------------------------------------------------------------------------
# Kernel
# ---------------------------------------------------------------------------
def _quadratic_kernel(w1_ref, w2_ref, b_ref, x_ref, o_ref):
    # Scalar params live in SMEM as (1,) f32 vectors.
    w1 = w1_ref[0]
    w2 = w2_ref[0]
    b = b_ref[0]
    x = x_ref[...].astype(jnp.float32)
    # 3 mul + 2 add per element on the VPU; kernel is pure HBM-bandwidth bound.
    o_ref[...] = (w1 * x * x + w2 * x + b).astype(o_ref.dtype)


# ---------------------------------------------------------------------------
# Tiling heuristics (all static / trace-time Python)
# ---------------------------------------------------------------------------
_MIN_TILE_BYTES = 512 * 1024        # below this, 0.35us/step overhead shows
_MAX_TILE_BYTES = 2 * 1024 * 1024   # 4x tile (dbl-buffered in+out) = 8 MiB << VMEM
_TARGET_STEPS = 8                   # >=4 steps per TensorCore on v7x megacore


def _round_up(v: int, m: int) -> int:
    return ((v + m - 1) // m) * m


def _sublane_multiple(dtype) -> int:
    # Native sublane tiling: f32 -> 8, bf16 -> 16, int8/fp8 -> 32.
    itemsize = jnp.dtype(dtype).itemsize
    return max(8, 32 // max(itemsize, 1))


def _pick_lane_cols(n: int) -> int:
    # Prefer a lane width that divides numel so we never pad the whole array.
    for lc in (512, 256, 128):
        if n % lc == 0:
            return lc
    return 512  # ragged fallback (padded path)


def _pick_block_rows(R: int, lane_cols: int, itemsize: int, sub: int) -> int:
    bytes_per_row = lane_cols * itemsize
    max_rows = max(sub, (_MAX_TILE_BYTES // bytes_per_row) // sub * sub)
    min_rows = max(sub, _round_up(max(_MIN_TILE_BYTES // bytes_per_row, 1), sub))
    rows_for_depth = _round_up(pl.cdiv(R, _TARGET_STEPS), sub)
    block_rows = min(max_rows, max(min_rows, rows_for_depth))
    if block_rows >= R:
        return R  # single full-extent block (always a legal block shape)
    return block_rows  # multiple of `sub`; ragged last block handled by Pallas


# ---------------------------------------------------------------------------
# Wrapper (jitted: all reshapes / casts fuse around the pallas_call)
# ---------------------------------------------------------------------------
@jax.jit
def quadratic_forward(x, weight1, weight2, bias):
    orig_shape = x.shape
    dtype = x.dtype
    n = x.size
    itemsize = jnp.dtype(dtype).itemsize
    sub = _sublane_multiple(dtype)

    lane_cols = _pick_lane_cols(n)
    n_pad = _round_up(n, lane_cols)

    flat = jnp.ravel(x)
    if n_pad != n:
        # TODO(synk): only hit when numel is not a multiple of 128; could use a
        # masked last block instead of padding.
        flat = jnp.pad(flat, (0, n_pad - n))
    R = n_pad // lane_cols
    x2d = flat.reshape(R, lane_cols)

    block_rows = _pick_block_rows(R, lane_cols, itemsize, sub)
    grid = (pl.cdiv(R, block_rows),)

    w1 = jnp.ravel(weight1).astype(jnp.float32)
    w2 = jnp.ravel(weight2).astype(jnp.float32)
    b = jnp.ravel(bias).astype(jnp.float32)

    cost = pl.CostEstimate(
        flops=5 * n, transcendentals=0, bytes_accessed=2 * n * itemsize
    )

    out2d = pl.pallas_call(
        _quadratic_kernel,
        out_shape=jax.ShapeDtypeStruct((R, lane_cols), dtype),
        grid=grid,
        in_specs=[
            pl.BlockSpec(memory_space=pltpu.SMEM),  # weight1
            pl.BlockSpec(memory_space=pltpu.SMEM),  # weight2
            pl.BlockSpec(memory_space=pltpu.SMEM),  # bias
            pl.BlockSpec((block_rows, lane_cols), lambda i: (i, 0)),
        ],
        out_specs=pl.BlockSpec((block_rows, lane_cols), lambda i: (i, 0)),
        compiler_params=pltpu.CompilerParams(
            dimension_semantics=("parallel",),
            vmem_limit_bytes=32 * 1024 * 1024,
        ),
        cost_estimate=cost,
    )(w1, w2, b, x2d)

    out_flat = out2d.reshape(-1)
    if n_pad != n:
        out_flat = out_flat[:n]
    return out_flat.reshape(orig_shape)


# ---------------------------------------------------------------------------
# Self-test
# ---------------------------------------------------------------------------
if __name__ == "__main__":
    key = jax.random.PRNGKey(0)
    k_w1, k_w2, k_b, k_x = jax.random.split(key, 4)

    # Deterministic "randn(1)"-style parameter init (matches module shapes).
    weight1 = jax.random.normal(k_w1, (1,), dtype=jnp.float32)
    weight2 = jax.random.normal(k_w2, (1,), dtype=jnp.float32)
    bias = jax.random.normal(k_b, (1,), dtype=jnp.float32)

    # Small example input consistent with an elementwise module.
    x = jax.random.normal(k_x, (2, 4, 16, 16), dtype=jnp.float32)

    out = quadratic_forward(x, weight1, weight2, bias)
    out = jax.block_until_ready(out)

    # Reference check against plain JAX.
    ref = weight1 * x**2 + weight2 * x + bias
    assert out.shape == x.shape and out.dtype == x.dtype
    assert jnp.allclose(out, ref, rtol=1e-6, atol=1e-6)

    print("KERNEL_OK")
</pallas_src>

<mosaic_0001>
module attributes {stable_mosaic.version = 11 : i64} {
  func.func @_quadratic_kernel(%arg0: i32, %arg1: memref<1xf32, #tpu.memory_space<smem>>, %arg2: memref<1xf32, #tpu.memory_space<smem>>, %arg3: memref<1xf32, #tpu.memory_space<smem>>, %arg4: memref<4x512xf32, #tpu.memory_space<vmem>>, %arg5: memref<4x512xf32, #tpu.memory_space<vmem>>) attributes {dimension_semantics = [#tpu.dimension_semantics<parallel>], iteration_bounds = array<i64: 1>, scalar_prefetch = 0 : i64, scratch_operands = 0 : i64, tpu.core_type = #tpu.core_type<tc>, window_params = [{transform_indices = @transform_0, window_bounds = array<i64: 1>}, {transform_indices = @transform_1, window_bounds = array<i64: 1>}, {transform_indices = @transform_2, window_bounds = array<i64: 1>}, {transform_indices = @transform_3, window_bounds = array<i64: 4, 512>}, {transform_indices = @transform_4, window_bounds = array<i64: 4, 512>}]} {
    %c0 = arith.constant 0 : index
    %0 = memref.load %arg1[%c0] : memref<1xf32, #tpu.memory_space<smem>>
    %c0_0 = arith.constant 0 : index
    %1 = memref.load %arg2[%c0_0] : memref<1xf32, #tpu.memory_space<smem>>
    %c0_1 = arith.constant 0 : index
    %2 = memref.load %arg3[%c0_1] : memref<1xf32, #tpu.memory_space<smem>>
    %c0_2 = arith.constant 0 : index
    %c0_3 = arith.constant 0 : index
    %3 = vector.load %arg4[%c0_2, %c0_3] : memref<4x512xf32, #tpu.memory_space<vmem>>, vector<4x512xf32>
    %4 = vector.broadcast %0 : f32 to vector<4x512xf32>
    %5 = arith.mulf %4, %3 : vector<4x512xf32>
    %6 = arith.mulf %5, %3 : vector<4x512xf32>
    %7 = vector.broadcast %1 : f32 to vector<4x512xf32>
    %8 = arith.mulf %7, %3 : vector<4x512xf32>
    %9 = arith.addf %6, %8 : vector<4x512xf32>
    %10 = vector.broadcast %2 : f32 to vector<4x512xf32>
    %11 = arith.addf %9, %10 : vector<4x512xf32>
    %c0_4 = arith.constant 0 : index
    %c0_5 = arith.constant 0 : index
    %12 = vector.load %arg5[%c0_4, %c0_5] : memref<4x512xf32, #tpu.memory_space<vmem>>, vector<4x512xf32>
    tpu.vector_store %arg5[%c0_4, %c0_5], %11 {strides = array<i32>} : memref<4x512xf32, #tpu.memory_space<vmem>>, vector<4x512xf32>,
    return
  }
  func.func @transform_0(%arg0: i32) -> i32 {
    %c0_i32 = arith.constant 0 : i32
    %c0_i32_0 = arith.constant 0 : i32
    return %c0_i32 : i32
  }
  func.func @transform_1(%arg0: i32) -> i32 {
    %c0_i32 = arith.constant 0 : i32
    %c0_i32_0 = arith.constant 0 : i32
    return %c0_i32 : i32
  }
  func.func @transform_2(%arg0: i32) -> i32 {
    %c0_i32 = arith.constant 0 : i32
    %c0_i32_0 = arith.constant 0 : i32
    return %c0_i32 : i32
  }
  func.func @transform_3(%arg0: i32) -> (i32, i32) {
    %c0_i32 = arith.constant 0 : i32
    %c0_i32_0 = arith.constant 0 : i32
    return %arg0, %c0_i32 : i32, i32
  }
  func.func @transform_4(%arg0: i32) -> (i32, i32) {
    %c0_i32 = arith.constant 0 : i32
    %c0_i32_0 = arith.constant 0 : i32
    return %arg0, %c0_i32 : i32, i32
  }
}

</mosaic_0001>

<bundles_post_ra>
// kernel: quadratic_forward.1
= control target key start
LH: loop header
LB: loop body
LE: loop exit
PB: predicated region body
PF: predicated region fallthrough
CT: control target
= control target key end

     0   :  { %s90_s0 = inlined_call_operand.<no memory space> [shape: f32[1], index: 0, kind: input, shape index: {}]   ;;  %s91_s1 = inlined_call_operand.<no memory space> [shape: f32[1], index: 1, kind: input, shape index: {}]   ;;  %s92_s3 = inlined_call_operand.vmem [shape: f32[4,512], index: 3, kind: input, shape index: {}]   ;;  %s93_s2 = inlined_call_operand.<no memory space> [shape: f32[1], index: 2, kind: input, shape index: {}]   ;;  %s94_s4 = inlined_call_operand.vmem [shape: f32[4,512], index: 4, kind: output, shape index: {}]  }
   0x1   :  { %v23_v0 = vld [vmem:[%s92_s3] sm:$0xff]  ;;  %v25_v1 = vstv %s90_s0  ;;  %v30_v2 = vstv %s91_s1  ;;  %v24_v5 = vld [vmem:[%s92_s3 + $0x8] sm:$0xff] }
   0x2   :  { %v26_v3 = vmul.f32 %v25_v1, %v23_v0  ;;  %v31_v4 = vmul.f32 %v30_v2, %v23_v0  ;;  %v27_v6 = vmul.f32 %v25_v1, %v24_v5  ;;  %v32_v7 = vmul.f32 %v30_v2, %v24_v5 }
   0x3   :  { %v35_v9 = vstv %s93_s2 }
   0x4   :  { %v28_v8 = vmul.f32 %v26_v3, %v23_v0  ;;  %v29_v10 = vmul.f32 %v27_v6, %v24_v5 }
   0x6   :  { %v33_v11 = vadd.f32 %v31_v4, %v28_v8  ;;  %v34_v12 = vadd.f32 %v32_v7, %v29_v10 }
   0x8   :  { %v36_v13 = vadd.f32 %v35_v9, %v33_v11  ;;  %v37_v14 = vadd.f32 %v35_v9, %v34_v12 }
   0xa   :  { %38 = vst [vmem:[%s94_s4] sm:$0xff] %v36_v13 }
   0xb   :  { %39 = vst [vmem:[%s94_s4 + $0x8] sm:$0xff] %v37_v14 }

</bundles_post_ra>
